<compile_context>
chip_gen: v5e
topology: v5e:2x2
jax: 0.10.0
libtpu: 0.0.40
codegen_flags: <defaults>
</compile_context>

<pallas_src>
import functools

import jax
import jax.numpy as jnp
from jax.experimental import pallas as pl
from jax.experimental.pallas import tpu as pltpu


def _metric_loss_kernel(x_ref, t_ref, o_ref, acc_ref, *,
                        n_rows, tile_rows, tiles_per_core):
    """One grid step: fold target*log(input) for one (tile_rows, W) tile.

    Grid = (num_cores, tiles_per_core). Axis 0 ("parallel") = per-core partials,
    axis 1 ("arbitrary") = sequential accumulation over row tiles.

    x_ref, t_ref : (tile_rows, W) VMEM tiles (native dtype, upcast here)
    o_ref        : (1, 1) SMEM — this core's partial sum of t*log(x)
    acc_ref      : (8, W) f32 VMEM vreg-scale accumulator
    """
    p = pl.program_id(0)   # core / parallel axis
    j = pl.program_id(1)   # accumulation axis

    @pl.when(j == 0)
    def _init():
        acc_ref[...] = jnp.zeros_like(acc_ref)

    # Unclamped tile index — used both for the full/partial split and for masking
    # ghost tiles whose index_map was clamped onto the last real tile.
    tile_idx = p * tiles_per_core + j
    row0 = tile_idx * tile_rows

    x = x_ref[...].astype(jnp.float32)
    t = t_ref[...].astype(jnp.float32)
    prod = t * jnp.log(x)          # NaN for 0*log(0), same as the torch reference

    w = x_ref.shape[1]
    groups = tile_rows // 8        # static: tile_rows is a multiple of 8

    is_full = row0 + tile_rows <= n_rows

    @pl.when(is_full)
    def _full_tile():
        # Hot path: pure VPU — fold sublane groups into the (8, W) accumulator.
        acc_ref[...] += prod.reshape(groups, 8, w).sum(axis=0)

    @pl.when(jnp.logical_not(is_full))
    def _partial_tile():
        # Cold path: last (partial) tile of a core, or a clamped ghost tile
        # (row0 >= n_rows -> mask all False -> contributes exactly 0).
        rows = row0 + jax.lax.broadcasted_iota(jnp.int32, (tile_rows, 1), 0)
        masked = jnp.where(rows < n_rows, prod, 0.0)
        acc_ref[...] += masked.reshape(groups, 8, w).sum(axis=0)

    @pl.when(j == pl.num_programs(1) - 1)
    def _finalize():
        o_ref[0, 0] = jnp.sum(acc_ref[...])   # single cross-lane reduce per core


def metric_loss(inp, target, *, max_block_bytes=None):
    """Pallas implementation of MetricLoss.forward.

    inp, target: [N, C] floating-point arrays (inp must be strictly positive).
    Returns a scalar float32: mean_i sum_j(-target[i,j] * log(inp[i,j])).
    """
    assert inp.shape == target.shape and inp.ndim == 2
    n, c = inp.shape
    e = n * c

    itemsizes = (jnp.dtype(inp.dtype).itemsize, jnp.dtype(target.dtype).itemsize)
    # Sublane packing alignment: 8 rows for 32-bit, 16 for 16-bit, 32 for 8-bit.
    sub = 8 * (4 // min(itemsizes))
    align_elems = sub * 128

    # --- Lane-dense view: the row structure does not matter for the total sum. ---
    x_flat = inp.reshape(-1)
    t_flat = target.reshape(-1)
    pad = (-e) % align_elems
    if pad:
        # Padded elements contribute exactly 0: target=0, log(input=1)=0.
        # Costs one HBM copy; only taken when N*C is not already aligned.
        x_flat = jnp.pad(x_flat, (0, pad), constant_values=1.0)
        t_flat = jnp.pad(t_flat, (0, pad), constant_values=0.0)
    e_pad = e + pad

    # Widest lane-dense width such that rows stays a multiple of the sublane align.
    w = 128
    for cand in (512, 256):
        if e_pad % (sub * cand) == 0:
            w = cand
            break
    rows = e_pad // w
    x2 = x_flat.reshape(rows, w)
    t2 = t_flat.reshape(rows, w)

    # --- VMEM budget & block sizing (generation-aware) ---
    try:
        vmem_cap = int(pltpu.get_tpu_info().vmem_capacity_bytes)
    except Exception:
        vmem_cap = 64 * 1024 * 1024           # conservative (v7x per-TC size)
    vmem_limit = int(min(vmem_cap * 3 // 4, 96 * 1024 * 1024))
    if max_block_bytes is None:
        # 2 inputs x 2 pipeline buffers resident + f32 temps -> ~1/12 of the limit
        # per block: ~4 MiB on v7x (64 MiB VMEM), ~8 MiB on v5e/v6e (128 MiB VMEM).
        max_block_bytes = max(256 * 1024, min(vmem_limit // 12, 16 * 1024 * 1024))

    bytes_per_row = w * max(itemsizes)
    cap_rows = max(sub, (max_block_bytes // bytes_per_row) // sub * sub)
    tile_rows = int(min(cap_rows, rows))      # rows is a multiple of `sub`

    n_tiles = pl.cdiv(rows, tile_rows)
    # 2-way core split only when it does not force a significant redundant
    # ("ghost") tile re-read: even tile counts split cleanly; >= 8 tiles makes one
    # ghost tile <= 1/8 extra traffic and worth using both TensorCores.
    num_cores = 2 if ((n_tiles % 2 == 0 and n_tiles >= 2) or n_tiles >= 8) else 1
    tiles_per_core = pl.cdiv(n_tiles, num_cores)
    grid = (num_cores, tiles_per_core)

    def in_index_map(p, j):
        # Clamp ghost tiles (past the end) onto the last real tile; the kernel's
        # row mask (computed from the UNCLAMPED index) zeroes their contribution.
        return (jnp.minimum(p * tiles_per_core + j, n_tiles - 1), 0)

    kernel = functools.partial(
        _metric_loss_kernel,
        n_rows=rows,
        tile_rows=tile_rows,
        tiles_per_core=tiles_per_core,
    )

    partials = pl.pallas_call(
        kernel,
        out_shape=jax.ShapeDtypeStruct((num_cores, 1), jnp.float32),
        grid_spec=pltpu.PrefetchScalarGridSpec(
            num_scalar_prefetch=0,
            grid=grid,
            in_specs=[
                pl.BlockSpec((tile_rows, w), in_index_map),
                pl.BlockSpec((tile_rows, w), in_index_map),
            ],
            out_specs=pl.BlockSpec((1, 1), lambda p, j: (p, 0),
                                   memory_space=pltpu.MemorySpace.SMEM),
            scratch_shapes=[pltpu.VMEM((8, w), jnp.float32)],
        ),
        compiler_params=pltpu.CompilerParams(
            # TODO(synk): on v7x verify in xprof that this axis shards across both
            # TensorCores; if not, switch it to pltpu.CORE_PARALLEL / pl.core_map.
            dimension_semantics=("parallel", "arbitrary"),
            vmem_limit_bytes=vmem_limit,
        ),
    )(x2, t2)

    # loss = mean_i sum_j(-t * log(x)) = -(sum of per-core partials) / N
    return jnp.sum(partials) * jnp.float32(-1.0 / n)


def _reference(inp, target):
    return jnp.mean(jnp.sum(-target * jnp.log(inp), axis=1))


if __name__ == "__main__":
    key = jax.random.PRNGKey(0)
    ks = jax.random.split(key, 6)

    # --- Test 1: aligned shapes (N=8, C=128) — no padding, single tile ---
    N, C = 8, 128
    inp = jax.nn.softmax(jax.random.normal(ks[0], (N, C), jnp.float32), axis=-1)
    tgt = jax.nn.softmax(jax.random.normal(ks[1], (N, C), jnp.float32), axis=-1)
    out = jax.block_until_ready(metric_loss(inp, tgt))
    ref = _reference(inp, tgt)
    assert jnp.allclose(out, ref, rtol=1e-5, atol=1e-6), (out, ref)

    # --- Test 2: non-128 class count (N=60, C=48) — padding path, multi-tile ---
    N2, C2 = 60, 48
    inp2 = jax.nn.softmax(jax.random.normal(ks[2], (N2, C2), jnp.float32), axis=-1)
    tgt2 = jax.nn.softmax(jax.random.normal(ks[3], (N2, C2), jnp.float32), axis=-1)
    out2 = jax.block_until_ready(metric_loss(inp2, tgt2, max_block_bytes=4096))
    ref2 = _reference(inp2, tgt2)
    assert jnp.allclose(out2, ref2, rtol=1e-4, atol=1e-6), (out2, ref2)

    # --- Test 3: many small tiles -> 2-core split + ghost-tile masking ---
    N3, C3 = 100, 128
    inp3 = jax.nn.softmax(jax.random.normal(ks[4], (N3, C3), jnp.float32), axis=-1)
    tgt3 = jax.nn.softmax(jax.random.normal(ks[5], (N3, C3), jnp.float32), axis=-1)
    out3 = jax.block_until_ready(metric_loss(inp3, tgt3, max_block_bytes=4096))
    ref3 = _reference(inp3, tgt3)
    assert jnp.allclose(out3, ref3, rtol=1e-4, atol=1e-6), (out3, ref3)

    # --- Test 4: same data, bigger tiles -> real partial (masked) last tile ---
    out4 = jax.block_until_ready(metric_loss(inp3, tgt3, max_block_bytes=8192))
    assert jnp.allclose(out4, ref3, rtol=1e-4, atol=1e-6), (out4, ref3)

    print("KERNEL_OK")
</pallas_src>

<mosaic_0001>
module attributes {stable_mosaic.version = 11 : i64} {
  func.func @_metric_loss_kernel(%arg0: i32, %arg1: i32, %arg2: memref<8x128xf32, #tpu.memory_space<vmem>>, %arg3: memref<8x128xf32, #tpu.memory_space<vmem>>, %arg4: memref<1x1xf32, #tpu.memory_space<smem>>, %arg5: memref<8x128xf32, #tpu.memory_space<vmem>>) attributes {dimension_semantics = [#tpu.dimension_semantics<parallel>, #tpu.dimension_semantics<arbitrary>], iteration_bounds = array<i64: 1, 1>, scalar_prefetch = 0 : i64, scratch_operands = 1 : i64, tpu.core_type = #tpu.core_type<tc>, window_params = [{transform_indices = @transform_0, window_bounds = array<i64: 8, 128>}, {transform_indices = @transform_1, window_bounds = array<i64: 8, 128>}, {transform_indices = @transform_2, window_bounds = array<i64: 1, 1>}]} {
    %c0_i32 = arith.constant 0 : i32
    %0 = arith.cmpi eq, %arg1, %c0_i32 : i32
    %1 = arith.extui %0 : i1 to i32
    %c0_i32_0 = arith.constant 0 : i32
    %2 = arith.cmpi ne, %1, %c0_i32_0 : i32
    scf.if %2 {
      %cst = arith.constant 0.000000e+00 : f32
      %20 = vector.broadcast %cst : f32 to vector<8x128xf32>
      %c0_10 = arith.constant 0 : index
      %c0_11 = arith.constant 0 : index
      %21 = vector.load %arg5[%c0_10, %c0_11] : memref<8x128xf32, #tpu.memory_space<vmem>>, vector<8x128xf32>
      tpu.vector_store %arg5[%c0_10, %c0_11], %20 {strides = array<i32>} : memref<8x128xf32, #tpu.memory_space<vmem>>, vector<8x128xf32>,
    } else {
    }
    %c1_i32 = arith.constant 1 : i32
    %3 = arith.muli %arg0, %c1_i32 : i32
    %4 = arith.addi %3, %arg1 : i32
    %c8_i32 = arith.constant 8 : i32
    %5 = arith.muli %4, %c8_i32 : i32
    %c0 = arith.constant 0 : index
    %c0_1 = arith.constant 0 : index
    %6 = vector.load %arg2[%c0, %c0_1] : memref<8x128xf32, #tpu.memory_space<vmem>>, vector<8x128xf32>
    %c0_2 = arith.constant 0 : index
    %c0_3 = arith.constant 0 : index
    %7 = vector.load %arg3[%c0_2, %c0_3] : memref<8x128xf32, #tpu.memory_space<vmem>>, vector<8x128xf32>
    %8 = math.log %6 : vector<8x128xf32>
    %9 = arith.mulf %7, %8 : vector<8x128xf32>
    %c8_i32_4 = arith.constant 8 : i32
    %10 = arith.addi %5, %c8_i32_4 : i32
    %c8_i32_5 = arith.constant 8 : i32
    %11 = arith.cmpi sle, %10, %c8_i32_5 : i32
    %12 = arith.extui %11 : i1 to i32
    %c0_i32_6 = arith.constant 0 : i32
    %13 = arith.cmpi ne, %12, %c0_i32_6 : i32
    scf.if %13 {
      %c0_10 = arith.constant 0 : index
      %c0_11 = arith.constant 0 : index
      %20 = vector.load %arg5[%c0_10, %c0_11] : memref<8x128xf32, #tpu.memory_space<vmem>>, vector<8x128xf32>
      %21 = vector.shape_cast %9 : vector<8x128xf32> to vector<1x8x128xf32>
      %cst = arith.constant dense<0.000000e+00> : vector<8x128xf32>
      %22 = vector.multi_reduction <add>, %21, %cst [0] : vector<1x8x128xf32> to vector<8x128xf32>
      %23 = arith.addf %20, %22 : vector<8x128xf32>
      %c0_12 = arith.constant 0 : index
      %c0_13 = arith.constant 0 : index
      %24 = vector.load %arg5[%c0_12, %c0_13] : memref<8x128xf32, #tpu.memory_space<vmem>>, vector<8x128xf32>
      tpu.vector_store %arg5[%c0_12, %c0_13], %23 {strides = array<i32>} : memref<8x128xf32, #tpu.memory_space<vmem>>, vector<8x128xf32>,
    } else {
    }
    %true = arith.constant true
    %14 = arith.xori %11, %true : i1
    %15 = arith.extui %14 : i1 to i32
    %c0_i32_7 = arith.constant 0 : i32
    %16 = arith.cmpi ne, %15, %c0_i32_7 : i32
    scf.if %16 {
      %20 = tpu.iota {dimensions = array<i32: 0>} : vector<8x1xi32>
      %21 = vector.broadcast %5 : i32 to vector<8x1xi32>
      %22 = arith.addi %21, %20 : vector<8x1xi32>
      %c8_i32_10 = arith.constant 8 : i32
      %23 = vector.broadcast %c8_i32_10 : i32 to vector<8x1xi32>
      %24 = arith.cmpi slt, %22, %23 : vector<8x1xi32>
      %cst = arith.constant 0.000000e+00 : f32
      %25 = vector.shape_cast %24 : vector<8x1xi1> to vector<8x1xi1>
      %26 = vector.broadcast %25 : vector<8x1xi1> to vector<8x128xi1>
      %27 = vector.broadcast %cst : f32 to vector<8x128xf32>
      %28 = arith.select %26, %9, %27 : vector<8x128xi1>, vector<8x128xf32>
      %c0_11 = arith.constant 0 : index
      %c0_12 = arith.constant 0 : index
      %29 = vector.load %arg5[%c0_11, %c0_12] : memref<8x128xf32, #tpu.memory_space<vmem>>, vector<8x128xf32>
      %30 = vector.shape_cast %28 : vector<8x128xf32> to vector<1x8x128xf32>
      %cst_13 = arith.constant dense<0.000000e+00> : vector<8x128xf32>
      %31 = vector.multi_reduction <add>, %30, %cst_13 [0] : vector<1x8x128xf32> to vector<8x128xf32>
      %32 = arith.addf %29, %31 : vector<8x128xf32>
      %c0_14 = arith.constant 0 : index
      %c0_15 = arith.constant 0 : index
      %33 = vector.load %arg5[%c0_14, %c0_15] : memref<8x128xf32, #tpu.memory_space<vmem>>, vector<8x128xf32>
      tpu.vector_store %arg5[%c0_14, %c0_15], %32 {strides = array<i32>} : memref<8x128xf32, #tpu.memory_space<vmem>>, vector<8x128xf32>,
    } else {
    }
    %c0_i32_8 = arith.constant 0 : i32
    %17 = arith.cmpi eq, %arg1, %c0_i32_8 : i32
    %18 = arith.extui %17 : i1 to i32
    %c0_i32_9 = arith.constant 0 : i32
    %19 = arith.cmpi ne, %18, %c0_i32_9 : i32
    scf.if %19 {
      %c0_10 = arith.constant 0 : index
      %c0_11 = arith.constant 0 : index
      %20 = vector.load %arg5[%c0_10, %c0_11] : memref<8x128xf32, #tpu.memory_space<vmem>>, vector<8x128xf32>
      %21 = vector.shape_cast %20 : vector<8x128xf32> to vector<1x8x128xf32>
      %cst = arith.constant dense<0.000000e+00> : vector<1xf32>
      %22 = vector.multi_reduction <add>, %21, %cst [1, 2] : vector<1x8x128xf32> to vector<1xf32>
      %23 = vector.shape_cast %22 : vector<1xf32> to vector<1x1x1xf32>
      %24 = vector.extract %23[0, 0, 0] : f32 from vector<1x1x1xf32>
      %c0_12 = arith.constant 0 : index
      %c0_13 = arith.constant 0 : index
      %25 = memref.load %arg4[%c0_12, %c0_13] : memref<1x1xf32, #tpu.memory_space<smem>>
      memref.store %24, %arg4[%c0_12, %c0_13] : memref<1x1xf32, #tpu.memory_space<smem>>
    } else {
    }
    return
  }
  func.func @transform_0(%arg0: i32, %arg1: i32) -> (i32, i32) {
    %c1_i32 = arith.constant 1 : i32
    %0 = arith.muli %arg0, %c1_i32 : i32
    %1 = arith.addi %0, %arg1 : i32
    %c0_i32 = arith.constant 0 : i32
    %2 = arith.minsi %1, %c0_i32 : i32
    %c0_i32_0 = arith.constant 0 : i32
    %c0_i32_1 = arith.constant 0 : i32
    return %2, %c0_i32_0 : i32, i32
  }
  func.func @transform_1(%arg0: i32, %arg1: i32) -> (i32, i32) {
    %c1_i32 = arith.constant 1 : i32
    %0 = arith.muli %arg0, %c1_i32 : i32
    %1 = arith.addi %0, %arg1 : i32
    %c0_i32 = arith.constant 0 : i32
    %2 = arith.minsi %1, %c0_i32 : i32
    %c0_i32_0 = arith.constant 0 : i32
    %c0_i32_1 = arith.constant 0 : i32
    return %2, %c0_i32_0 : i32, i32
  }
  func.func @transform_2(%arg0: i32, %arg1: i32) -> (i32, i32) {
    %c0_i32 = arith.constant 0 : i32
    %c0_i32_0 = arith.constant 0 : i32
    return %arg0, %c0_i32 : i32, i32
  }
}

</mosaic_0001>

<bundles_post_ra>
// kernel: tpu_custom_call.1
= control target key start
LH: loop header
LB: loop body
LE: loop exit
PB: predicated region body
PF: predicated region fallthrough
CT: control target
= control target key end

     0   :  { %7 = vsyncpa [#allocation4], 0  ;;  %s229_s0 = inlined_call_operand.hbm [shape: f32[8,128], index: 0, kind: input, shape index: {}]   ;;  %s230_s1 = inlined_call_operand.hbm [shape: f32[8,128], index: 1, kind: input, shape index: {}]   ;;  %s231_s2 = inlined_call_operand.hbm [shape: f32[1,1], index: 2, kind: output, shape index: {}]  }
   0x1   :  { %8 = vsyncpa [#allocation7], 0 }
   0x2   :  { %9 = vsyncpa [#allocation5], 0  ;;  %s20_s11 = sshll.u32 %s229_s0, 4  ;;  %s202_s12 = smov [#allocation3]   ;;  %s21_s11 = int_to_ptr.hbm [resolvable:$true] %s20_s11 }
   0x3   :  { %s22_s13 = sshll.u32 %s202_s12, 4  ;;  %s36_s16 = sshll.u32 %s230_s1, 4  ;;  %s23_s13 = int_to_ptr.vmem [resolvable:$true] %s22_s13  ;;  %s37_s16 = int_to_ptr.hbm [resolvable:$true] %s36_s16 }
   0x4   :  { %25 = dma.hbm_to_vmem [thread:$0]  %s21_s11, 128, %s23_s13, [#allocation4]  }
   0x5   :  { %s203_s17 = smov [#allocation6]  }
   0x6   :  { %s38_s18 = sshll.u32 %s203_s17, 4  ;;  %s39_s18 = int_to_ptr.vmem [resolvable:$true] %s38_s18 }
   0x7   :  { %41 = dma.hbm_to_vmem [thread:$0]  %s37_s16, 128, %s39_s18, [#allocation7]  }
   0x8   :  { %196 = dma.done.wait [#allocation4], 128  }
   0x9   :  { %197 = vsyncadd [#allocation4], 4294967168 }
   0xa   :  { %198 = dma.done.wait [#allocation7], 128  }
   0xb   :  { %199 = vsyncadd [#allocation7], 4294967168  ;;  %v63_v0 = vld [vmem:[#allocation3] sm:$0xff]  ;;  %v64_v2 = vld [vmem:[#allocation6] sm:$0xff]  ;;  %s113_s19 = sshll.u32 %s231_s2, 4  ;;  %s204_s21 = smov [#allocation8]   ;;  %s114_s19 = int_to_ptr.hbm [resolvable:$true] %s113_s19 }
   0xc   :  { %134 = vlog2.f32 %v63_v0 }
  0x12   :  { %v135_v1 = vpop.eup %134 }
  0x13   :  { %v66_v3 = vmul.f32 0.6931472, %v135_v1 }
  0x15   :  { %v67_v4 = vmul.f32 %v66_v3, %v64_v2 }
  0x17   :  { %97 = vadd.xlane.f32.xlu0 %v67_v4 }
  0x8a   :  { %v98_v5 = vpop.xlane.xlu0 %97 }
  0x8b   :  { %v99_v6 = vrot.slane %v98_v5, 4 }
  0x8d   :  { %v100_v7 = vadd.f32 %v99_v6, %v98_v5 }
  0x8f   :  { %v101_v8 = vrot.slane %v100_v7, 2 }
  0x91   :  { %v102_v9 = vadd.f32 %v101_v8, %v100_v7 }
  0x93   :  { %v103_v10 = vrot.slane %v102_v9, 1 }
  0x95   :  { %v104_v11 = vadd.f32 %v103_v10, %v102_v9 }
  0x97   :  { %129 = vpush %v104_v11 }
  0xc8   :  { %s130_s20 = spop %129 }
  0xc9   :  { %107 = sst [smem:[#allocation8]] %s130_s20 }
  0xca   :  { %116 = dma.smem_to_hbm %s204_s21, 16, %s114_s19, [#allocation5]  }
  0xcb   :  { %200 = dma.done.wait [#allocation5], 16  }
  0xcc   :  { %201 = vsyncadd [#allocation5], 4294967280 }
  0xcd   :  { %121 = sfence }
  0xce   :  { %122 = vsyncpa [#allocation4], 1 }
  0xcf   :  { %123 = vsyncpa [#allocation7], 1 }
  0xd0   :  { %124 = vsyncpa [#allocation5], 1 }

</bundles_post_ra>
